<compile_context>
chip_gen: v6e
topology: v6e:2x2x1
jax: 0.10.0
libtpu: 0.0.40
codegen_flags: <defaults>
</compile_context>

<pallas_src>
import numpy as np
import jax
import jax.numpy as jnp
from jax import lax
from jax.experimental import pallas as pl
from jax.experimental.pallas import tpu as pltpu

_EPS = 1e-12                  # torch.nn.functional.normalize default eps
_EPS_SQ = _EPS * _EPS
_MIN_GRID_STEPS = 8           # feed both v7x TensorCores + keep pipeline busy
_SEL_MAX_BYTES = 2 << 20      # max size of a resident 0/1 selection matrix


# --------------------------------------------------------------------------
# Generation-aware budgets
# --------------------------------------------------------------------------
def _budgets():
    """Returns (per-tile f32-equivalent byte budget, vmem_limit_bytes)."""
    try:
        vmem_phys = int(pltpu.get_tpu_info().vmem_capacity_bytes)
    except Exception:
        vmem_phys = 64 << 20                     # conservative (v7x-class)
    if vmem_phys >= (96 << 20):                  # v5e / v6e: 128 MiB physical
        return 6 << 20, 64 << 20
    return 4 << 20, 40 << 20                     # v7x: 64 MiB physical


# --------------------------------------------------------------------------
# Kernel bodies
# --------------------------------------------------------------------------
def _scaled_store(x, xf, scale, o_ref):
    # Review item: for bf16 don't keep the full-tile f32 upcast live for the
    # final multiply; use the native tile with a downcast scale.  f32 (and
    # f16, which could overflow a downcast scale) keep the f32 multiply.
    if x.dtype == jnp.bfloat16:
        o_ref[...] = (x * scale.astype(jnp.bfloat16)).astype(o_ref.dtype)
    else:
        o_ref[...] = (xf * scale).astype(o_ref.dtype)


def _l2norm_lane_kernel(x_ref, o_ref):
    # (tile_r, D): normalize along the last (lane) axis.
    x = x_ref[...]
    xf = x.astype(jnp.float32)
    ss = jnp.sum(xf * xf, axis=-1, keepdims=True)
    scale = lax.rsqrt(jnp.maximum(ss, _EPS_SQ))          # EUP, not a divide
    _scaled_store(x, xf, scale, o_ref)


def _l2norm_mid_kernel(x_ref, o_ref):
    # (pre_tile, C, tile_post): normalize along axis 1 (sublane reduce);
    # the spatial axis stays lane-dense so stores are unmasked full vst.
    x = x_ref[...]
    xf = x.astype(jnp.float32)
    ss = jnp.sum(xf * xf, axis=1, keepdims=True)
    scale = lax.rsqrt(jnp.maximum(ss, _EPS_SQ))
    _scaled_store(x, xf, scale, o_ref)


def _l2norm_group_kernel(sel_ref, selt_ref, x_ref, o_ref):
    # Lane-dense grouped normalize: rows of width G contain `n_groups`
    # independent normalization groups.  sel (G, n_groups) / selt (n_groups, G)
    # are 0/1 selection matrices; the group reduce and the broadcast back are
    # two small MXU matmuls (the kernel is HBM-bound, MXU is idle anyway).
    x = x_ref[...]
    xf = x.astype(jnp.float32)
    ss = lax.dot_general(xf * xf, sel_ref[...], (((1,), (0,)), ((), ())),
                         preferred_element_type=jnp.float32)
    scale = lax.dot_general(lax.rsqrt(jnp.maximum(ss, _EPS_SQ)), selt_ref[...],
                            (((1,), (0,)), ((), ())),
                            preferred_element_type=jnp.float32)
    _scaled_store(x, xf, scale, o_ref)


# --------------------------------------------------------------------------
# Tile sizing
# --------------------------------------------------------------------------
def _pick_tile_rows(R, D, budget):
    """Row-tile for a (R, D) array normalized/processed along full rows."""
    if R <= 16:
        return R
    lane_padded = ((max(D, 1) + 127) // 128) * 128       # VMEM lane padding
    bytes_per_row = lane_padded * 4
    t_budget = max(1, budget // bytes_per_row)           # byte budget: only hard cap
    t_split = pl.cdiv(R, _MIN_GRID_STEPS)                # multi-step grid for v7x
    t_floor = max(16, (budget // _MIN_GRID_STEPS) // bytes_per_row)
    t = min(t_budget, max(t_split, t_floor))             # never split below ~budget/8
    t = max(16, (t // 16) * 16)                          # sublane quantum (bf16-safe)
    return R if t >= R else t


def _pick_tiles_mid(pre, C, post, budget):
    """(pre_tile, tile_post) for the (pre, C, post) sublane-reduce path."""
    c_pad = ((C + 7) // 8) * 8                           # sublane padding in VMEM
    if post <= 128:
        tile_post = post
    else:
        t = max(128, ((budget // (4 * c_pad)) // 128) * 128)
        tile_post = min((post // 128) * 128, t)
    post_pad = ((tile_post + 127) // 128) * 128
    per_pre = c_pad * post_pad * 4
    pre_tile = max(1, min(pre, budget // per_pre))
    # v7x megacore: prefer >= ~8 grid steps, but never shrink below ~budget/8.
    while (pl.cdiv(pre, pre_tile) * pl.cdiv(post, tile_post) < _MIN_GRID_STEPS
           and pre_tile * per_pre > budget // _MIN_GRID_STEPS):
        if pre_tile > 1:
            pre_tile = pl.cdiv(pre_tile, 2)
        elif tile_post > 128:
            tile_post = max(128, ((tile_post // 2) // 128) * 128)
            post_pad = tile_post
            per_pre = c_pad * post_pad * 4
        else:
            break
    return pre_tile, tile_post


def _fold_rows_for_lanes(R, D, max_width=1024):
    """Largest K dividing R with 128 <= K*D <= max_width (prefer K*D % 128 == 0)."""
    best = None
    kmax = min(R, max_width // max(D, 1))
    for K in range(kmax, 1, -1):
        if R % K:
            continue
        width = K * D
        if width < 128:
            break
        if width % 128 == 0:
            return K
        if best is None:
            best = K
    return best


# --------------------------------------------------------------------------
# pallas_call wrappers
# --------------------------------------------------------------------------
def _l2norm_last(x2, budget, vmem_limit):
    R, D = x2.shape
    tile_r = _pick_tile_rows(R, D, budget)
    itemsize = jnp.dtype(x2.dtype).itemsize
    return pl.pallas_call(
        _l2norm_lane_kernel,
        out_shape=jax.ShapeDtypeStruct((R, D), x2.dtype),
        grid_spec=pltpu.PrefetchScalarGridSpec(
            num_scalar_prefetch=0,
            grid=(pl.cdiv(R, tile_r),),
            in_specs=[pl.BlockSpec((tile_r, D), lambda i: (i, 0))],
            out_specs=pl.BlockSpec((tile_r, D), lambda i: (i, 0)),
        ),
        compiler_params=pltpu.CompilerParams(
            dimension_semantics=("parallel",),
            vmem_limit_bytes=vmem_limit),
        cost_estimate=pl.CostEstimate(
            flops=3 * R * D, transcendentals=R,
            bytes_accessed=2 * R * D * itemsize),
    )(x2)


def _l2norm_mid(x3, budget, vmem_limit):
    pre, C, post = x3.shape
    pre_tile, tile_post = _pick_tiles_mid(pre, C, post, budget)
    itemsize = jnp.dtype(x3.dtype).itemsize
    return pl.pallas_call(
        _l2norm_mid_kernel,
        out_shape=jax.ShapeDtypeStruct((pre, C, post), x3.dtype),
        grid_spec=pltpu.PrefetchScalarGridSpec(
            num_scalar_prefetch=0,
            grid=(pl.cdiv(pre, pre_tile), pl.cdiv(post, tile_post)),
            in_specs=[pl.BlockSpec((pre_tile, C, tile_post),
                                   lambda i, j: (i, 0, j))],
            out_specs=pl.BlockSpec((pre_tile, C, tile_post),
                                   lambda i, j: (i, 0, j)),
        ),
        compiler_params=pltpu.CompilerParams(
            dimension_semantics=("parallel", "parallel"),
            vmem_limit_bytes=vmem_limit),
        cost_estimate=pl.CostEstimate(
            flops=3 * pre * C * post, transcendentals=pre * post,
            bytes_accessed=2 * pre * C * post * itemsize),
    )(x3)


def _l2norm_grouped(x2, group_ids, n_groups, budget, vmem_limit):
    """x2: (R, G) lane-dense rows; column j belongs to group group_ids[j]."""
    R, G = x2.shape
    sel = (group_ids[:, None] ==
           jnp.arange(n_groups, dtype=jnp.int32)[None, :]).astype(jnp.float32)
    selt = jnp.transpose(sel)                            # (n_groups, G)
    tile_r = _pick_tile_rows(R, G, budget)
    itemsize = jnp.dtype(x2.dtype).itemsize
    return pl.pallas_call(
        _l2norm_group_kernel,
        out_shape=jax.ShapeDtypeStruct((R, G), x2.dtype),
        grid_spec=pltpu.PrefetchScalarGridSpec(
            num_scalar_prefetch=0,
            grid=(pl.cdiv(R, tile_r),),
            in_specs=[pl.BlockSpec((G, n_groups), lambda i: (0, 0)),   # resident
                      pl.BlockSpec((n_groups, G), lambda i: (0, 0)),   # resident
                      pl.BlockSpec((tile_r, G), lambda i: (i, 0))],
            out_specs=pl.BlockSpec((tile_r, G), lambda i: (i, 0)),
        ),
        compiler_params=pltpu.CompilerParams(
            dimension_semantics=("parallel",),
            vmem_limit_bytes=vmem_limit),
        cost_estimate=pl.CostEstimate(
            flops=4 * R * G * n_groups + 3 * R * G,
            transcendentals=R * n_groups,
            bytes_accessed=2 * R * G * itemsize + 2 * G * n_groups * 4),
    )(sel, selt, x2)


def _l2norm_last_chunked(x2, budget, vmem_limit):
    """Two-pass fallback when a full-D row block would blow the VMEM budget."""
    R, D = x2.shape
    tile_d = max(128, min((D // 128) * 128,
                          ((budget // (16 * 4)) // 128) * 128))
    if R <= 16:
        tile_r = R
    else:
        tile_r = max(16, ((budget // (tile_d * 4)) // 16) * 16)
        tile_r = R if tile_r >= R else tile_r
    grid_r, grid_d = pl.cdiv(R, tile_r), pl.cdiv(D, tile_d)

    def ss_kernel(x_ref, ss_ref):
        k = pl.program_id(1)

        @pl.when(k == 0)
        def _():
            ss_ref[...] = jnp.zeros_like(ss_ref)

        xf = x_ref[...].astype(jnp.float32)
        if D % tile_d:  # mask the ragged tail of the reduction axis
            col = k * tile_d + lax.broadcasted_iota(jnp.int32, xf.shape, 1)
            xf = jnp.where(col < D, xf, 0.0)
        ss_ref[...] += jnp.sum(xf * xf, axis=-1, keepdims=True)

    ss = pl.pallas_call(
        ss_kernel,
        out_shape=jax.ShapeDtypeStruct((R, 1), jnp.float32),
        grid_spec=pltpu.PrefetchScalarGridSpec(
            num_scalar_prefetch=0,
            grid=(grid_r, grid_d),
            in_specs=[pl.BlockSpec((tile_r, tile_d), lambda i, k: (i, k))],
            out_specs=pl.BlockSpec((tile_r, 1), lambda i, k: (i, 0)),
        ),
        compiler_params=pltpu.CompilerParams(
            dimension_semantics=("parallel", "arbitrary"),
            vmem_limit_bytes=vmem_limit),
    )(x2)

    def scale_kernel(ss_ref, x_ref, o_ref):
        x = x_ref[...]
        xf = x.astype(jnp.float32)
        scale = lax.rsqrt(jnp.maximum(ss_ref[...], _EPS_SQ))
        _scaled_store(x, xf, scale, o_ref)

    return pl.pallas_call(
        scale_kernel,
        out_shape=jax.ShapeDtypeStruct((R, D), x2.dtype),
        grid_spec=pltpu.PrefetchScalarGridSpec(
            num_scalar_prefetch=0,
            grid=(grid_r, grid_d),
            in_specs=[pl.BlockSpec((tile_r, 1), lambda i, k: (i, 0)),
                      pl.BlockSpec((tile_r, tile_d), lambda i, k: (i, k))],
            out_specs=pl.BlockSpec((tile_r, tile_d), lambda i, k: (i, k)),
        ),
        compiler_params=pltpu.CompilerParams(
            dimension_semantics=("parallel", "parallel"),
            vmem_limit_bytes=vmem_limit),
    )(ss, x2)


def _l2norm_rows(x2, budget, vmem_limit):
    """Normalize along the last axis of a 2-D view, picking the best layout."""
    R, D = x2.shape
    if max(min(R, 16), 1) * D * 4 > budget:
        return _l2norm_last_chunked(x2, budget, vmem_limit)
    if D < 128 and R > 1:
        K = _fold_rows_for_lanes(R, D)
        if K is not None and (K * D) * K * 4 <= _SEL_MAX_BYTES:
            # Fold K rows into one lane-dense row of width K*D (contiguous,
            # zero-copy); groups are contiguous lane segments of width D.
            y = _l2norm_grouped(
                x2.reshape(R // K, K * D),
                jnp.arange(K * D, dtype=jnp.int32) // D, K,
                budget, vmem_limit)
            return y.reshape(R, D)
    return _l2norm_last(x2, budget, vmem_limit)


def normalize(x, dim):
    """Equivalent of Normalize(dim)(x) == F.normalize(x, dim=dim, p=2)."""
    ndim = x.ndim
    dim = dim % ndim
    shape = x.shape
    budget, vmem_limit = _budgets()

    pre = int(np.prod(shape[:dim], dtype=np.int64)) if dim > 0 else 1
    C = int(shape[dim])
    post = (int(np.prod(shape[dim + 1:], dtype=np.int64))
            if dim < ndim - 1 else 1)

    if post == 1:
        # Normalized axis is (effectively) the minor axis.
        y = _l2norm_rows(x.reshape(pre, C), budget, vmem_limit)
        return y.reshape(shape)

    G = C * post
    if (post < 128 and G >= 128 and G * post * 4 <= _SEL_MAX_BYTES
            and 16 * G * 4 <= budget):
        # Interior dim with small spatial extent: present contiguous
        # lane-dense (pre, C*post) rows; groups are lanes with stride `post`.
        y = _l2norm_grouped(
            x.reshape(pre, G),
            jnp.arange(G, dtype=jnp.int32) % post, post,
            budget, vmem_limit)
        return y.reshape(shape)

    # TODO(synk): post < 128 with C*post < 128 (tiny groups) and extremely
    # large C both still use the sublane-reduce path below (masked stores /
    # full-C blocks); data volume is negligible resp. rare for this module.
    y = _l2norm_mid(x.reshape(pre, C, post), budget, vmem_limit)
    return y.reshape(shape)


class Normalize:
    """Mirror of the PyTorch module."""

    def __init__(self, dim: int) -> None:
        self.dim = dim

    def __call__(self, x):
        return normalize(x, self.dim)


# --------------------------------------------------------------------------
# Self-test
# --------------------------------------------------------------------------
if __name__ == "__main__":
    key = jax.random.PRNGKey(0)
    x = jax.random.normal(key, (2, 4, 16, 16), dtype=jnp.float32)

    def ref(v, dim):
        n = jnp.sqrt(jnp.sum(v.astype(jnp.float32) ** 2, axis=dim,
                             keepdims=True))
        return (v.astype(jnp.float32) / jnp.maximum(n, _EPS)).astype(v.dtype)

    # NCHW channel normalize (dim=1, post=256): 3-D sublane-reduce path.
    y1 = jax.block_until_ready(Normalize(1)(x))
    assert y1.shape == x.shape and y1.dtype == x.dtype
    np.testing.assert_allclose(np.asarray(y1), np.asarray(ref(x, 1)),
                               rtol=1e-5, atol=1e-6)

    # Last-axis normalize (D=16 < 128): lane-dense folded/grouped path.
    y2 = jax.block_until_ready(normalize(x, -1))
    np.testing.assert_allclose(np.asarray(y2), np.asarray(ref(x, -1)),
                               rtol=1e-5, atol=1e-6)

    # Interior dim with small spatial (post=64 < 128): lane-dense grouped path.
    xs = jax.random.normal(jax.random.PRNGKey(0), (2, 4, 8, 8),
                           dtype=jnp.float32)
    y3 = jax.block_until_ready(normalize(xs, 1))
    np.testing.assert_allclose(np.asarray(y3), np.asarray(ref(xs, 1)),
                               rtol=1e-5, atol=1e-6)

    # Wide last axis (D=256 >= 128): plain lane-reduce path.
    xw = jax.random.normal(jax.random.PRNGKey(0), (32, 256),
                           dtype=jnp.float32)
    y4 = jax.block_until_ready(normalize(xw, -1))
    np.testing.assert_allclose(np.asarray(y4), np.asarray(ref(xw, -1)),
                               rtol=1e-5, atol=1e-6)

    # Chunked-D fallback, exercised with a tiny forced budget (ragged D tail).
    xc = jax.random.normal(jax.random.PRNGKey(0), (32, 1100),
                           dtype=jnp.float32)
    y5 = jax.block_until_ready(_l2norm_last_chunked(xc, 32 * 1024, 40 << 20))
    np.testing.assert_allclose(np.asarray(y5), np.asarray(ref(xc, -1)),
                               rtol=1e-5, atol=1e-6)

    print("KERNEL_OK")
</pallas_src>

<mosaic_0001>
module attributes {stable_mosaic.version = 11 : i64} {
  func.func @_l2norm_mid_kernel(%arg0: i32, %arg1: i32, %arg2: memref<2x4x256xf32, #tpu.memory_space<vmem>>, %arg3: memref<2x4x256xf32, #tpu.memory_space<vmem>>) attributes {dimension_semantics = [#tpu.dimension_semantics<parallel>, #tpu.dimension_semantics<parallel>], iteration_bounds = array<i64: 1, 1>, scalar_prefetch = 0 : i64, scratch_operands = 0 : i64, tpu.core_type = #tpu.core_type<tc>, window_params = [{transform_indices = @transform_0, window_bounds = array<i64: 2, 4, 256>}, {transform_indices = @transform_1, window_bounds = array<i64: 2, 4, 256>}]} {
    %c0 = arith.constant 0 : index
    %c0_0 = arith.constant 0 : index
    %c0_1 = arith.constant 0 : index
    %0 = vector.load %arg2[%c0, %c0_0, %c0_1] : memref<2x4x256xf32, #tpu.memory_space<vmem>>, vector<2x4x256xf32>
    %1 = arith.mulf %0, %0 : vector<2x4x256xf32>
    %cst = arith.constant dense<0.000000e+00> : vector<2x256xf32>
    %2 = vector.multi_reduction <add>, %1, %cst [1] : vector<2x4x256xf32> to vector<2x256xf32>
    %3 = vector.shape_cast %2 : vector<2x256xf32> to vector<2x1x256xf32>
    %cst_2 = arith.constant 1.000000e-24 : f32
    %4 = vector.broadcast %cst_2 : f32 to vector<2x1x256xf32>
    %5 = arith.maximumf %3, %4 : vector<2x1x256xf32>
    %6 = math.rsqrt %5 : vector<2x1x256xf32>
    %7 = vector.broadcast %6 : vector<2x1x256xf32> to vector<2x4x256xf32>
    %8 = arith.mulf %0, %7 : vector<2x4x256xf32>
    %c0_3 = arith.constant 0 : index
    %c0_4 = arith.constant 0 : index
    %c0_5 = arith.constant 0 : index
    %9 = vector.load %arg3[%c0_3, %c0_4, %c0_5] : memref<2x4x256xf32, #tpu.memory_space<vmem>>, vector<2x4x256xf32>
    tpu.vector_store %arg3[%c0_3, %c0_4, %c0_5], %8 {strides = array<i32>} : memref<2x4x256xf32, #tpu.memory_space<vmem>>, vector<2x4x256xf32>,
    return
  }
  func.func @transform_0(%arg0: i32, %arg1: i32) -> (i32, i32, i32) {
    %c0_i32 = arith.constant 0 : i32
    %c0_i32_0 = arith.constant 0 : i32
    return %arg0, %c0_i32, %arg1 : i32, i32, i32
  }
  func.func @transform_1(%arg0: i32, %arg1: i32) -> (i32, i32, i32) {
    %c0_i32 = arith.constant 0 : i32
    %c0_i32_0 = arith.constant 0 : i32
    return %arg0, %c0_i32, %arg1 : i32, i32, i32
  }
}

</mosaic_0001>

<bundles_post_ra>
// kernel: tpu_custom_call.1
= control target key start
LH: loop header
LB: loop body
LE: loop exit
PB: predicated region body
PF: predicated region fallthrough
CT: control target
= control target key end

     0   :  { %6 = vsyncpa [#allocation3], 0  ;;  %s181_s0 = inlined_call_operand.hbm [shape: f32[2,4,256], index: 0, kind: input, shape index: {}]   ;;  %s182_s1 = inlined_call_operand.hbm [shape: f32[2,4,256], index: 1, kind: output, shape index: {}]  }
   0x1   :  { %7 = vsyncpa [#allocation4], 0  ;;  %s155_s6 = smov [#allocation2]  }
   0x2   :  { %s13_s7 = sshll.u32 %s155_s6, 4  ;;  %s14_s7 = int_to_ptr.vmem [resolvable:$true] %s13_s7 }
   0x3   :  { %s119_s8 = scalar_lea.vmem %s14_s7, 256  ;;  %p124_p1 = scmp.lt.s32.totalorder %s14_s7, %s14_s7 }
   0x4   :  { %p120_p0 = scmp.ne.s32.totalorder %s14_s7, %s119_s8  ;;  %p125_p2 = scmp.lt.s32.totalorder %s119_s8, %s119_s8 }
   0x6   :  { %p126_p3 = por %p125_p2, %p124_p1 }
   0x8   :  { %p127_p4 = pnand %p126_p3, %p120_p0 }
   0xa   :  { %130 = shalt.err (!%p127_p4)
}
   0xb   :  { %s156_s9 = smov 128   ;;  %s157_s10 = smov 8  }
   0xc   :  { %19 = dma.hbm_to_vmem [thread:$0]  %s181_s0, 256, %s14_s7, [#allocation3], %s156_s9, %s156_s9, %s157_s10  }
   0xd   :  { %151 = dma.done.wait [#allocation3], 256  }
   0xe   :  { %152 = vsyncadd [#allocation3], 4294967040  ;;  %v23_v0 = vld [vmem:[#allocation2] sm:$0xff]  ;;  %vm33_vm0 = vcmask 1043456   ;;  %v24_v1 = vld [vmem:[#allocation2 + $0x8] sm:$0xff]  ;;  %s158_s0 = smov [#allocation5]  }
   0xf   :  { %v25_v2 = vmul.f32 %v23_v0, %v23_v0  ;;  %v26_v3 = vmul.f32 %v24_v1, %v24_v1  ;;  %s87_s13 = sshll.u32 %s158_s0, 4  ;;  %s88_s13 = int_to_ptr.vmem [resolvable:$true] %s87_s13 }
  0x10   :  { %s131_s14 = scalar_lea.vmem %s88_s13, 256  ;;  %p136_p6 = scmp.lt.s32.totalorder %s88_s13, %s88_s13 }
  0x11   :  { %v29_v4 = vcombine.high %v25_v2, %v25_v2  ;;  %v34_v5 = vsel %vm33_vm0, %v25_v2, 0.0  ;;  %v30_v6 = vcombine.high %v26_v3, %v26_v3  ;;  %v48_v7 = vsel %vm33_vm0, %v26_v3, 0.0  ;;  %p132_p5 = scmp.ne.s32.totalorder %s88_s13, %s131_s14  ;;  %p137_p7 = scmp.lt.s32.totalorder %s131_s14, %s131_s14 }
  0x12   :  { %v35_v8 = vrot.slane %v34_v5, 4  ;;  %v49_v9 = vrot.slane %v48_v7, 4 }
  0x13   :  { %v41_v10 = vsel %vm33_vm0, %v29_v4, 0.0  ;;  %v55_v11 = vsel %vm33_vm0, %v30_v6, 0.0  ;;  %p138_p8 = por %p137_p7, %p136_p6 }
  0x14   :  { %v36_v12 = vadd.f32 %v35_v8, %v34_v5  ;;  %v42_v13 = vrot.slane %v41_v10, 4  ;;  %v50_v14 = vadd.f32 %v49_v9, %v48_v7  ;;  %v56_v15 = vrot.slane %v55_v11, 4 }
  0x15   :  { %p139_p9 = pnand %p138_p8, %p132_p5 }
  0x16   :  { %v37_v16 = vrot.slane %v36_v12, 2  ;;  %v43_v17 = vadd.f32 %v42_v13, %v41_v10  ;;  %v51_v18 = vrot.slane %v50_v14, 2  ;;  %v57_v19 = vadd.f32 %v56_v15, %v55_v11 }
  0x18   :  { %v38_v20 = vadd.f32 %v37_v16, %v36_v12  ;;  %v44_v21 = vrot.slane %v43_v17, 2  ;;  %v52_v22 = vadd.f32 %v51_v18, %v50_v14  ;;  %v58_v23 = vrot.slane %v57_v19, 2 }
  0x1a   :  { %v39_v24 = vrot.slane %v38_v20, 1  ;;  %v45_v25 = vadd.f32 %v44_v21, %v43_v17  ;;  %v53_v26 = vrot.slane %v52_v22, 1  ;;  %v59_v27 = vadd.f32 %v58_v23, %v57_v19 }
  0x1c   :  { %v40_v28 = vadd.f32 %v39_v24, %v38_v20  ;;  %v46_v29 = vrot.slane %v45_v25, 1  ;;  %v54_v30 = vadd.f32 %v53_v26, %v52_v22  ;;  %v60_v31 = vrot.slane %v59_v27, 1 }
  0x1e   :  { %v47_v32 = vadd.f32 %v46_v29, %v45_v25  ;;  %v62_v33 = vmax.f32 %v40_v28, 1e-24  ;;  %v61_v34 = vadd.f32 %v60_v31, %v59_v27  ;;  %v64_v35 = vmax.f32 %v54_v30, 1e-24 }
  0x20   :  { %v63_v36 = vmax.f32 %v47_v32, 1e-24  ;;  %103 = vrsqrt.f32 %v62_v33  ;;  %v65_v37 = vmax.f32 %v61_v34, 1e-24 }
  0x21   :  { %105 = vrsqrt.f32 %v64_v35 }
  0x22   :  { %107 = vrsqrt.f32 %v63_v36 }
  0x23   :  { %109 = vrsqrt.f32 %v65_v37 }
  0x2d   :  { %v104_v38 = vpop.eup %103 }
  0x2e   :  { %v106_v39 = vpop.eup %105 }
  0x2f   :  { %v108_v40 = vpop.eup %107 }
  0x30   :  { %v110_v41 = vpop.eup %109  ;;  %v74_v42 = vcombine.low %v104_v38, %v108_v40 }
  0x31   :  { %v75_v43 = vcombine.low %v106_v39, %v110_v41 }
  0x32   :  { %v78_v44 = vmul.f32 %v74_v42, %v23_v0 }
  0x33   :  { %v79_v45 = vmul.f32 %v75_v43, %v24_v1 }
  0x34   :  { %80 = vst [vmem:[#allocation5] sm:$0xff] %v78_v44 }
  0x35   :  { %81 = vst [vmem:[#allocation5 + $0x8] sm:$0xff] %v79_v45 }
  0x36   :  { %142 = shalt.err (!%p139_p9)
}
  0x37   :  { %93 = dma.vmem_to_hbm [thread:$0]  %s88_s13, 256, %s182_s1, [#allocation4], %s156_s9, %s156_s9, %s157_s10  }
  0x38   :  { %153 = dma.done.wait [#allocation4], 256  }
  0x39   :  { %154 = vsyncadd [#allocation4], 4294967040 }
  0x3a   :  { %97 = vsyncpa [#allocation3], 1 }
  0x3b   :  { %98 = vsyncpa [#allocation4], 1 }

</bundles_post_ra>
